<compile_context>
chip_gen: v6e
topology: v6e:2x2x1
jax: 0.10.0
libtpu: 0.0.40
codegen_flags: <defaults>
</compile_context>

<pallas_src>
import functools

import jax
import jax.numpy as jnp
from jax.experimental import pallas as pl
from jax.experimental.pallas import tpu as pltpu


def _cfm_kernel(seed_ref, t_ref, x0_ref, x1_ref, xt_ref, ut_ref, *, sigma: float):
    # seed_ref: SMEM (1,) int32 (scalar-prefetch; only used when sigma > 0).
    # t_ref:    VMEM (TB, 1) f32 per-row times (broadcasts across the lane axis).
    # x0/x1/xt/ut refs: VMEM (TB, TN) tiles.
    x0 = x0_ref[...].astype(jnp.float32)
    x1 = x1_ref[...].astype(jnp.float32)
    t = t_ref[...]
    xt = t * x1 + (1.0 - t) * x0          # matches torch: t*x1 + (1-t)*x0
    ut = x1 - x0
    if sigma > 0.0:
        # Fused path noise: one pass over HBM instead of a separate RNG kernel.
        # Per-tile seeding via multiple seed words avoids int32 overflow for
        # large grids.
        # TODO(synk): noise field still depends on the (TB, TN) tiling choice,
        # so it is not bit-reproducible across tile-size changes.
        pltpu.prng_seed(seed_ref[0], pl.program_id(0), pl.program_id(1))
        xt = xt + sigma * pltpu.stateful_normal(x0_ref.shape, jnp.float32)
    xt_ref[...] = xt.astype(xt_ref.dtype)
    ut_ref[...] = ut.astype(ut_ref.dtype)


def conditional_flow_matcher_forward(x0, x1, key, sigma: float = 0.0):
    """JAX/Pallas equivalent of ConditionalFlowMatcher.forward.

    Args:
      x0: (B, C, H, W) starting points.
      x1: (B, C, H, W) end points.
      key: jax PRNG key used to sample t (and seed the fused noise if sigma > 0).
      sigma: path noise std (rectified flow uses 0.0).

    Returns:
      t:  (B,) float32
      xt: (B, C, H, W)
      ut: (B, C, H, W)
    """
    assert x0.shape == x1.shape and x0.ndim == 4
    B, C, H, W = x0.shape
    N = C * H * W
    dtype = x0.dtype
    itemsize = jnp.dtype(dtype).itemsize

    # t sampled exactly as torch.rand(B): f32, kept in f32 all the way through.
    t = jax.random.uniform(key, (B,), dtype=jnp.float32)
    # Seed for the (optional) fused in-kernel noise.
    seed = jax.random.randint(
        jax.random.fold_in(key, 1), (1,), 0, jnp.iinfo(jnp.int32).max,
        dtype=jnp.int32,
    )

    x0_flat = x0.reshape(B, N)
    x1_flat = x1.reshape(B, N)
    t_col = t.reshape(B, 1)

    # ---- Tile sizing (bytes-based, no padding / no divisor hunting) ----
    # TB: up to 256 rows. For B <= 256 use the full batch dim (always a legal
    # block shape); for larger B use 256 (multiple of 8) with a partial last
    # block handled by Pallas.
    TB = B if B <= 256 else 256
    # TN: target ~2 MiB per streamed tile regardless of dtype, as a multiple of
    # 128 (or the full lane dim when N is small enough).
    target_tile_bytes = 2 * 1024 * 1024
    tn_cap = max(512, (target_tile_bytes // (TB * itemsize)) // 128 * 128)
    TN = N if N <= tn_cap else tn_cap
    grid_b = pl.cdiv(B, TB)
    grid_n = pl.cdiv(N, TN)

    # v7x megacore: if the natural grid is a single step, split the lane axis
    # so both TensorCores get work (negligible cost on single-TC v5e/v6e).
    if grid_b * grid_n == 1 and TN >= 256:
        tn_half = (TN // 2) // 128 * 128
        if tn_half >= 128 and pl.cdiv(N, tn_half) >= 2:
            TN = tn_half
            grid_n = pl.cdiv(N, TN)

    grid = (grid_b, grid_n)

    kernel = functools.partial(_cfm_kernel, sigma=float(sigma))

    # Bandwidth-bound cost hint: 2 reads + 2 writes of (B, N), ~4 flops/elem.
    cost = pl.CostEstimate(
        flops=4 * B * N,
        transcendentals=(2 * B * N) if sigma > 0.0 else 0,
        bytes_accessed=4 * B * N * itemsize + 4 * B,
    )

    # NOTE: batch MUST stay as grid axis 0 (outer). The lane axis iterates
    # fastest, so the t column's block index (i, 0) only changes once per
    # row-tile and its DMA is not re-issued for every lane tile.
    xt_flat, ut_flat = pl.pallas_call(
        kernel,
        out_shape=(
            jax.ShapeDtypeStruct((B, N), dtype),
            jax.ShapeDtypeStruct((B, N), dtype),
        ),
        grid_spec=pltpu.PrefetchScalarGridSpec(
            num_scalar_prefetch=1,            # seed -> SMEM once, before the grid
            grid=grid,
            in_specs=[
                pl.BlockSpec((TB, 1), lambda i, j, seed: (i, 0)),   # t column
                pl.BlockSpec((TB, TN), lambda i, j, seed: (i, j)),  # x0
                pl.BlockSpec((TB, TN), lambda i, j, seed: (i, j)),  # x1
            ],
            out_specs=[
                pl.BlockSpec((TB, TN), lambda i, j, seed: (i, j)),  # xt
                pl.BlockSpec((TB, TN), lambda i, j, seed: (i, j)),  # ut
            ],
        ),
        compiler_params=pltpu.CompilerParams(
            dimension_semantics=("parallel", "parallel"),
            # 4 streams x 2 buffers x ~2 MiB = ~16 MiB of pipeline buffers.
            # 32 MiB gives 2x headroom, covers v5e's 16 MiB default scoped
            # limit, and stays well under v7x's 64 MiB physical VMEM.
            vmem_limit_bytes=32 * 1024 * 1024,
        ),
        cost_estimate=cost,
    )(seed, t_col, x0_flat, x1_flat)

    xt = xt_flat.reshape(B, C, H, W)
    ut = ut_flat.reshape(B, C, H, W)
    return t, xt, ut


if __name__ == "__main__":
    key = jax.random.PRNGKey(0)
    k0, k1, kt = jax.random.split(key, 3)

    B, C, H, W = 2, 4, 16, 16
    x0 = jax.random.normal(k0, (B, C, H, W), dtype=jnp.float32)
    x1 = jax.random.normal(k1, (B, C, H, W), dtype=jnp.float32)

    t, xt, ut = conditional_flow_matcher_forward(x0, x1, kt, sigma=0.0)
    jax.block_until_ready((t, xt, ut))

    # Reference check in plain JAX (matches the PyTorch formulation).
    tb = t.reshape(B, 1, 1, 1)
    xt_ref = tb * x1 + (1.0 - tb) * x0
    ut_ref = x1 - x0
    assert t.shape == (B,)
    assert bool(jnp.all((t >= 0.0) & (t < 1.0)))
    assert xt.shape == (B, C, H, W) and ut.shape == (B, C, H, W)
    assert jnp.allclose(xt, xt_ref, atol=1e-6)
    assert jnp.allclose(ut, ut_ref, atol=1e-6)

    print("KERNEL_OK")
</pallas_src>

<mosaic_0001>
module attributes {stable_mosaic.version = 11 : i64} {
  func.func @_cfm_kernel(%arg0: i32, %arg1: i32, %arg2: memref<1xi32, #tpu.memory_space<smem>>, %arg3: memref<2x1xf32, #tpu.memory_space<vmem>>, %arg4: memref<2x512xf32, #tpu.memory_space<vmem>>, %arg5: memref<2x512xf32, #tpu.memory_space<vmem>>, %arg6: memref<2x512xf32, #tpu.memory_space<vmem>>, %arg7: memref<2x512xf32, #tpu.memory_space<vmem>>) attributes {dimension_semantics = [#tpu.dimension_semantics<parallel>, #tpu.dimension_semantics<parallel>], iteration_bounds = array<i64: 1, 2>, scalar_prefetch = 1 : i64, scratch_operands = 0 : i64, tpu.core_type = #tpu.core_type<tc>, window_params = [{transform_indices = @transform_0, window_bounds = array<i64: 2, 1>}, {transform_indices = @transform_1, window_bounds = array<i64: 2, 512>}, {transform_indices = @transform_2, window_bounds = array<i64: 2, 512>}, {transform_indices = @transform_3, window_bounds = array<i64: 2, 512>}, {transform_indices = @transform_4, window_bounds = array<i64: 2, 512>}]} {
    %c0 = arith.constant 0 : index
    %c0_0 = arith.constant 0 : index
    %0 = vector.load %arg4[%c0, %c0_0] : memref<2x512xf32, #tpu.memory_space<vmem>>, vector<2x512xf32>
    %c0_1 = arith.constant 0 : index
    %c0_2 = arith.constant 0 : index
    %1 = vector.load %arg5[%c0_1, %c0_2] : memref<2x512xf32, #tpu.memory_space<vmem>>, vector<2x512xf32>
    %c0_3 = arith.constant 0 : index
    %c0_4 = arith.constant 0 : index
    %2 = vector.load %arg3[%c0_3, %c0_4] : memref<2x1xf32, #tpu.memory_space<vmem>>, vector<2x1xf32>
    %3 = vector.broadcast %2 : vector<2x1xf32> to vector<2x512xf32>
    %4 = arith.mulf %3, %1 : vector<2x512xf32>
    %cst = arith.constant 1.000000e+00 : f32
    %5 = vector.broadcast %cst : f32 to vector<2x1xf32>
    %6 = arith.subf %5, %2 : vector<2x1xf32>
    %7 = vector.broadcast %6 : vector<2x1xf32> to vector<2x512xf32>
    %8 = arith.mulf %7, %0 : vector<2x512xf32>
    %9 = arith.addf %4, %8 : vector<2x512xf32>
    %10 = arith.subf %1, %0 : vector<2x512xf32>
    %c0_5 = arith.constant 0 : index
    %c0_6 = arith.constant 0 : index
    %11 = vector.load %arg6[%c0_5, %c0_6] : memref<2x512xf32, #tpu.memory_space<vmem>>, vector<2x512xf32>
    tpu.vector_store %arg6[%c0_5, %c0_6], %9 {strides = array<i32>} : memref<2x512xf32, #tpu.memory_space<vmem>>, vector<2x512xf32>,
    %c0_7 = arith.constant 0 : index
    %c0_8 = arith.constant 0 : index
    %12 = vector.load %arg7[%c0_7, %c0_8] : memref<2x512xf32, #tpu.memory_space<vmem>>, vector<2x512xf32>
    tpu.vector_store %arg7[%c0_7, %c0_8], %10 {strides = array<i32>} : memref<2x512xf32, #tpu.memory_space<vmem>>, vector<2x512xf32>,
    return
  }
  func.func @transform_0(%arg0: i32, %arg1: i32, %arg2: memref<1xi32, #tpu.memory_space<smem>>) -> (i32, i32) {
    %c0_i32 = arith.constant 0 : i32
    %c0_i32_0 = arith.constant 0 : i32
    return %arg0, %c0_i32 : i32, i32
  }
  func.func @transform_1(%arg0: i32, %arg1: i32, %arg2: memref<1xi32, #tpu.memory_space<smem>>) -> (i32, i32) {
    %c0_i32 = arith.constant 0 : i32
    return %arg0, %arg1 : i32, i32
  }
  func.func @transform_2(%arg0: i32, %arg1: i32, %arg2: memref<1xi32, #tpu.memory_space<smem>>) -> (i32, i32) {
    %c0_i32 = arith.constant 0 : i32
    return %arg0, %arg1 : i32, i32
  }
  func.func @transform_3(%arg0: i32, %arg1: i32, %arg2: memref<1xi32, #tpu.memory_space<smem>>) -> (i32, i32) {
    %c0_i32 = arith.constant 0 : i32
    return %arg0, %arg1 : i32, i32
  }
  func.func @transform_4(%arg0: i32, %arg1: i32, %arg2: memref<1xi32, #tpu.memory_space<smem>>) -> (i32, i32) {
    %c0_i32 = arith.constant 0 : i32
    return %arg0, %arg1 : i32, i32
  }
}

</mosaic_0001>

<bundles_post_ra>
// kernel: tpu_custom_call.1
= control target key start
LH: loop header
LB: loop body
LE: loop exit
PB: predicated region body
PF: predicated region fallthrough
CT: control target
= control target key end

     0   :  { %12 = vsyncpa [#allocation5], 0  ;;  %s1106_s0 = inlined_call_operand.<no memory space> [shape: s32[1], index: 0, kind: input, shape index: {}]   ;;  %s1107_s1 = inlined_call_operand.vmem [shape: f32[2,1], index: 1, kind: input, shape index: {}]   ;;  %s1108_s2 = inlined_call_operand.hbm [shape: f32[2,1024], index: 2, kind: input, shape index: {}]   ;;  %s1109_s3 = inlined_call_operand.hbm [shape: f32[2,1024], index: 3, kind: input, shape index: {}]   ;;  %s1110_s4 = inlined_call_operand.hbm [shape: f32[2,1024], index: 4, kind: output, shape index: {0}]   ;;  %s1111_s5 = inlined_call_operand.hbm [shape: f32[2,1024], index: 5, kind: output, shape index: {1}]  }
   0x1   :  { %14 = vsyncpa [#allocation5 + $0x1], 0 }
   0x2   :  { %15 = vsyncpa [#allocation8], 0 }
   0x3   :  { %17 = vsyncpa [#allocation8 + $0x1], 0 }
   0x4   :  { %18 = vsyncpa [#allocation6], 0 }
   0x5   :  { %20 = vsyncpa [#allocation6 + $0x1], 0 }
   0x6   :  { %21 = vsyncpa [#allocation11], 0 }
   0x7   :  { %23 = vsyncpa [#allocation11 + $0x1], 0  ;;  %s916_s0 = smov 0   ;;  %s918_s18 = smov 0  }
   0x8   :  { %s920_s19 = smov 0   ;;  %s922_s20 = smov 0  }
   0x9   :  { %s924_s21 = smov 0   ;;  %s926_s22 = smov 0  }
   0xa LB: > { %s603_s23 = sadd.s32 4294967295, %s878_s22   ;;  %s604_s24 = sadd.s32 4294967294, %s878_s22   ;;  %s878_s22 = sphi %s926_s22, %s29_s22   ;;  %s874_s21 = sphi %s924_s21, %s1123_s21   ;;  %s870_s20 = sphi %s922_s20, %s1122_s20   ;;  %s866_s19 = sphi %s920_s19, %s1121_s19   ;;  %s862_s18 = sphi %s918_s18, %s1120_s18   ;;  %s858_s0 = sphi %s916_s0, %s1119_s0  }
   0xb   : > { %s38_s25 = sadd.s32 1, %s874_s21  ;;  %s76_s26 = sadd.s32 1, %s866_s19 }
   0xc   : > { %p39_p0 = scmp.ge.s32.totalorder %s38_s25, 2  ;;  %p83_p1 = scmp.ne.s32.totalorder %s866_s19, %s862_s18 }
   0xd   : > { %p84_p2 = scmp.eq.s32.totalorder %s878_s22, 0  ;;  %p89_p3 = scmp.ne.s32.totalorder %s862_s18, %s858_s0 }
   0xe   : > { %s1125_s25 = smov (%p39_p0, %s38_s25), 0  ;;  %p90_p5 = scmp.eq.s32.totalorder %s603_s23, 0 }
   0xf   : > { %p957_p4 = por %p84_p2, %p83_p1  ;;  %s72_s28 = ssub.s32 %s874_s21, %s1125_s25 }
  0x10   : > { %p143_p6 = scmp.eq.s32.totalorder %s603_s23, 1  ;;  %p74_p7 = scmp.eq.s32.totalorder %s72_s28, 0 }
  0x11   : > { %p963_p8 = por %p90_p5, %p89_p3  ;;  %p149_p10 = scmp.eq.s32.totalorder %s604_s24, 1 }
  0x12   : > { %p967_p9 = por %p143_p6, %p83_p1  ;;  %p653_p13 = scmp.lt.s32.totalorder %s878_s22, 2 }
  0x13   : > { %s972_s6 = scalar_select %p74_p7, %s866_s19, %s76_s26  }
  0x14   : > { %p974_p11 = por %p149_p10, %p89_p3  ;;  %s981_s8 = sand.u32 1, %s866_s19  }
  0x15   : > { %s608_s9 = sshll.u32 %s981_s8, 3  ;;  %s627_s10 = sshll.u32 %s874_s21, 7 }
  0x16   : > { %s216_s13 = scalar_lea.hbm %s1108_s2, %s627_s10  ;;  %s208_s14 = scalar_lea.vmem [#allocation4], %s608_s9 }
  0x17   : > { %s218_s15 = sshll.u32 %s208_s14, 4  ;;  %p990_p0 = pnand %p653_p13, %p957_p4  ;;  %s219_s15 = int_to_ptr.vmem [resolvable:$true] %s218_s15 }
  0x18   : > { %p614_p1 = scmp.ge.s32.totalorder %s878_s22, 1  ;;  %p244_p2 = scmp.lt.s32.totalorder %s878_s22, 3 }
  0x19   : > { %s205_s17 = scalar_lea.sflag [#allocation5], %s981_s8  ;;  %p710_p3 = pneg %p990_p0 }
  0x1a   : > { %s721_s23 = scalar_lea.vmem %s219_s15, 128  ;;  %s880_s24 = smov [#allocation4]  }
  0x1b   : > { %p722_p5 = scmp.ne.s32.totalorder %s219_s15, %s721_s23  ;;  %s726_s26 = sshll.u32 %s880_s24, 4  ;;  %s727_s26 = int_to_ptr.vmem [resolvable:$false] %s726_s26 }
  0x1c   : > { %s728_s27 = scalar_lea.vmem %s727_s26, 256  ;;  %p729_p4 = scmp.lt.s32.totalorder %s219_s15, %s727_s26 }
  0x1d   : > { %p724_p6 = pnand %p722_p5, %p710_p3  ;;  %p730_p10 = scmp.lt.s32.totalorder %s728_s27, %s721_s23 }
  0x1f   : > { %p725_p7 = pneg %p724_p6  ;;  %p731_p13 = por %p730_p10, %p729_p4 }
  0x21   : > { %p732_p12 = pnand %p731_p13, %p725_p7 }
  0x23   : > { %735 = shalt.err (!%p732_p12)
}
  0x24   : > { %642 = dma.hbm_to_vmem [thread:$0]  (!%p990_p0), %s216_s13, 128, %s219_s15, %s205_s17  }
  0x25   : > { %p1008_p5 = pnand %p614_p1, %p244_p2  ;;  %s237_s14 = scalar_lea.hbm %s1109_s3, %s627_s10 }
  0x26   : > { %s229_s23 = scalar_lea.vmem [#allocation7], %s608_s9  ;;  %s226_s26 = scalar_lea.sflag [#allocation8], %s981_s8 }
  0x27   : > { %s239_s24 = sshll.u32 %s229_s23, 4  ;;  %s881_s13 = smov [#allocation7]   ;;  %s240_s24 = int_to_ptr.vmem [resolvable:$true] %s239_s24 }
  0x28   : > { %s749_s27 = scalar_lea.vmem %s240_s24, 128  ;;  %s754_s15 = sshll.u32 %s881_s13, 4  ;;  %s755_s15 = int_to_ptr.vmem [resolvable:$false] %s754_s15 }
  0x29   : > { %p750_p12 = scmp.ne.s32.totalorder %s240_s24, %s749_s27  ;;  %s756_s17 = scalar_lea.vmem %s755_s15, 256 }
  0x2a   : > { %p757_p1 = scmp.lt.s32.totalorder %s240_s24, %s755_s15  ;;  %p758_p2 = scmp.lt.s32.totalorder %s756_s17, %s749_s27 }
  0x2b   : > { %p752_p6 = pnand %p750_p12, %p710_p3 }
  0x2c   : > { %p759_p4 = por %p758_p2, %p757_p1 }
  0x2d   : > { %p753_p7 = pneg %p752_p6 }
  0x2f   : > { %p760_p10 = pnand %p759_p4, %p753_p7 }
  0x31   : > { %763 = shalt.err (!%p760_p10)
}
  0x32   : > { %645 = dma.hbm_to_vmem [thread:$0]  (!%p990_p0), %s237_s14, 128, %s240_s24, %s226_s26  }
  0x33   : > { %248 = sbr.rel (%p1008_p5) target bundleno = 212 (0xd4), region = 32  ;;  %s1024_s8 = sand.u32 (!%p1008_p5), 1, %s862_s18  }
  0x34   : > { %s1027_s9 = sshll.u32 (!%p1008_p5), %s1024_s8, 3  ;;  %s251_s10 = scalar_lea.sflag (!%p1008_p5), [#allocation5], %s1024_s8 }
  0x35   : > { %s254_s11 = scalar_lea.vmem (!%p1008_p5), [#allocation4], %s1027_s9 }
  0x38   : > { %841 = dma.done.wait (%p963_p8), %s251_s10, 128  }
  0x39   : > { %843 = vsyncadd (%p963_p8), %s251_s10, 4294967168  ;;  %s260_s16 = scalar_lea.sflag [#allocation8], %s1024_s8  ;;  %s263_s28 = scalar_lea.vmem [#allocation7], %s1027_s9 }
  0x3a   : > { %845 = dma.done.wait (%p963_p8), %s260_s16, 128  }
  0x3b   : > { %847 = vsyncadd (%p963_p8), %s260_s16, 4294967168  ;;  %v882_v0 = vmov 0   ;;  %v312_v1 = vld [vmem:[%s1107_s1] sm:$0x3]  ;;  %v311_v3 = vld [vmem:[%s263_s28] sm:$0xff]  ;;  %s629_s23 = sshll.u32 %s870_s20, 7 }
  0x3c   : > { %705 = vset.pattern.permute.xlu0 %v882_v0  ;;  %v344_v2 = vsub.f32 1.0, %v312_v1  ;;  %v310_v4 = vld [vmem:[%s254_s11] sm:$0xff]  ;;  %s301_s29 = scalar_lea.vmem [#allocation10], %s1027_s9  ;;  %s441_s27 = scalar_lea.hbm %s1111_s5, %s629_s23 }
  0x3d   : > { %315 = vperm.xlu0 %705, %v312_v1   ;;  %v380_v5 = vsub.f32 %v311_v3, %v310_v4  ;;  %s443_s13 = sshll.u32 %s301_s29, 4  ;;  %s411_s15 = scalar_lea.sflag [#allocation11], %s1024_s8  ;;  %s444_s13 = int_to_ptr.vmem [resolvable:$true] %s443_s13 }
  0x3e   : > { %s764_s17 = scalar_lea.vmem %s444_s13, 128  ;;  %s883_s10 = smov [#allocation10]  }
  0x3f   : > { %404 = vst [vmem:[%s301_s29] sm:$0xff] %v380_v5  ;;  %p765_p8 = scmp.ne.s32.totalorder %s444_s13, %s764_s17  ;;  %s768_s16 = sshll.u32 %s883_s10, 4  ;;  %s769_s16 = int_to_ptr.vmem [resolvable:$false] %s768_s16 }
  0x40   : > { %s770_s11 = scalar_lea.vmem %s769_s16, 256  ;;  %p771_p13 = scmp.lt.s32.totalorder %s444_s13, %s769_s16 }
  0x41   : > { %347 = vperm.xlu0 %705, %v344_v2   ;;  %p766_p0 = pnand %p765_p8, %p967_p9  ;;  %p772_p5 = scmp.lt.s32.totalorder %s770_s11, %s764_s17 }
  0x43   : > { %p767_p3 = pneg %p766_p0  ;;  %p773_p12 = por %p772_p5, %p771_p13 }
  0x45   : > { %p774_p6 = pnand %p773_p12, %p767_p3 }
  0x47   : > { %777 = shalt.err (!%p774_p6)
}
  0x48   : > { %s778_s28 = scalar_lea.hbm %s441_s27, 128  ;;  %s782_s29 = scalar_lea.hbm %s1111_s5, 256 }
  0x49   : > { %p779_p7 = scmp.ne.s32.totalorder %s441_s27, %s778_s28  ;;  %p783_p4 = scmp.lt.s32.totalorder %s441_s27, %s1111_s5 }
  0x4a   : > { %p784_p10 = scmp.lt.s32.totalorder %s782_s29, %s778_s28 }
  0x4b   : > { %p780_p1 = pnand %p779_p7, %p967_p9 }
  0x4c   : > { %p785_p8 = por %p784_p10, %p783_p4 }
  0x4d   : > { %p781_p2 = pneg %p780_p1 }
  0x4f   : > { %p786_p0 = pnand %p785_p8, %p781_p2 }
  0x51   : > { %789 = shalt.err (!%p786_p0)
}
  0x52   : > { %636 = dma.vmem_to_hbm [thread:$0]  (%p967_p9), %s444_s13, 128, %s441_s27, %s411_s15   ;;  %v884_v6 = vmov 1983009808   ;;  %v323_v8 = vlaneseq  ;;  %v319_v12 = vcombine.high %v311_v3, %v311_v3  ;;  %v351_v13 = vcombine.high %v310_v4, %v310_v4 }
  0x53   : > { %v321_v7 = vunpack.c.l.s4 %v884_v6  ;;  %s294_s27 = scalar_lea.vmem [#allocation9], %s1027_s9  ;;  %s425_s10 = scalar_lea.hbm %s1110_s4, %s629_s23 }
  0x54   : > { %v324_v10 = vshrl.u32 %v323_v8, 7  ;;  %s427_s13 = sshll.u32 %s294_s27, 4  ;;  %s406_s16 = scalar_lea.sflag [#allocation6], %s1024_s8  ;;  %s428_s13 = int_to_ptr.vmem [resolvable:$true] %s427_s13 }
  0x55   : > { %v322_v9 = vunpack.c.0.s8 %v321_v7  ;;  %s790_s11 = scalar_lea.vmem %s428_s13, 128  ;;  %s885_s28 = smov [#allocation9]  }
  0x56   : > { %p791_p3 = scmp.ne.s32.totalorder %s428_s13, %s790_s11  ;;  %s794_s12 = sshll.u32 %s885_s28, 4  ;;  %s795_s12 = int_to_ptr.vmem [resolvable:$false] %s794_s12 }
  0x57   : > { %v325_v11 = vsub.s32 %v322_v9, %v324_v10  ;;  %s796_s9 = scalar_lea.vmem %s795_s12, 256  ;;  %p797_p12 = scmp.lt.s32.totalorder %s428_s13, %s795_s12 }
  0x58   : > { %p792_p13 = pnand %p791_p3, %p967_p9  ;;  %p798_p6 = scmp.lt.s32.totalorder %s796_s9, %s790_s11 }
  0x59   : > { %v326_v14 = vrot.slane %v311_v3, %v325_v11  ;;  %v333_v15 = vrot.slane %v319_v12, %v325_v11  ;;  %v358_v16 = vrot.slane %v310_v4, %v325_v11  ;;  %v365_v17 = vrot.slane %v351_v13, %v325_v11 }
  0x5a   : > { %p793_p5 = pneg %p792_p13  ;;  %p799_p7 = por %p798_p6, %p797_p12 }
  0x5b   : > { %v334_v19 = vcombine.high %v326_v14, %v326_v14  ;;  %v335_v20 = vcombine.high %v333_v15, %v333_v15  ;;  %v366_v21 = vcombine.high %v358_v16, %v358_v16  ;;  %v367_v22 = vcombine.high %v365_v17, %v365_v17 }
  0x5c   : > { %p800_p1 = pnand %p799_p7, %p793_p5 }
  0xb8   : > { %v316_v18 = vpop.permute.xlu0 %315 }
  0xb9   : > { %v340_v23 = vmul.f32 %v326_v14, %v316_v18  ;;  %v341_v24 = vmul.f32 %v334_v19, %v316_v18  ;;  %v342_v25 = vmul.f32 %v333_v15, %v316_v18  ;;  %v343_v26 = vmul.f32 %v335_v20, %v316_v18 }
  0xbc   : > { %v348_v27 = vpop.permute.xlu0 %347 }
  0xbd   : > { %v372_v28 = vmul.f32 %v358_v16, %v348_v27  ;;  %v373_v29 = vmul.f32 %v366_v21, %v348_v27  ;;  %v374_v30 = vmul.f32 %v365_v17, %v348_v27  ;;  %v375_v31 = vmul.f32 %v367_v22, %v348_v27 }
  0xbf   : > { %v376_v32 = vadd.f32 %v372_v28, %v340_v23  ;;  %v377_v33 = vadd.f32 %v373_v29, %v341_v24  ;;  %v378_v34 = vadd.f32 %v374_v30, %v342_v25  ;;  %v379_v35 = vadd.f32 %v375_v31, %v343_v26 }
  0xc1   : > { %v385_v36 = vcombine.low %v376_v32, %v377_v33  ;;  %v386_v37 = vcombine.low %v378_v34, %v379_v35 }
  0xc3   : > { %v393_v38 = vrot.slane %v385_v36, %v325_v11  ;;  %v400_v39 = vrot.slane %v386_v37, %v325_v11 }
  0xc5   : > { %v401_v40 = vcombine.low %v393_v38, %v400_v39 }
  0xc7   : > { %403 = vst [vmem:[%s294_s27] sm:$0xff] %v401_v40 }
  0xc8   : > { %803 = shalt.err (!%p800_p1)
}
  0xc9   : > { %s804_s20 = scalar_lea.hbm %s425_s10, 128  ;;  %s808_s14 = scalar_lea.hbm %s1110_s4, 256 }
  0xca   : > { %p805_p2 = scmp.ne.s32.totalorder %s425_s10, %s804_s20  ;;  %p809_p8 = scmp.lt.s32.totalorder %s425_s10, %s1110_s4 }
  0xcb   : > { %p810_p0 = scmp.lt.s32.totalorder %s808_s14, %s804_s20 }
  0xcc   : > { %p806_p4 = pnand %p805_p2, %p967_p9 }
  0xcd   : > { %p811_p3 = por %p810_p0, %p809_p8 }
  0xce   : > { %p807_p10 = pneg %p806_p4 }
  0xd0   : > { %p812_p13 = pnand %p811_p3, %p807_p10 }
  0xd2   : > { %815 = shalt.err (!%p812_p13)
}
  0xd3   : > { %635 = dma.vmem_to_hbm [thread:$0]  (%p967_p9), %s428_s13, 128, %s425_s10, %s406_s16  }
  0xd4 PF: > { %s455_s26 = sand.u32 1, %s858_s0   ;;  %p1118_p5 = scmp.ge.s32.totalorder %s878_s22, 2 }
  0xd5   : > { %s456_s27 = scalar_lea.sflag [#allocation6], %s455_s26 }
  0xd6   : > { %p647_p12 = pnand %p1118_p5, %p974_p11 }
  0xd8   : > { %p648_p6 = pneg %p647_p12 }
  0xda   : > { %849 = dma.done.wait (%p648_p6), %s456_s27, 128  }
  0xdb   : > { %851 = vsyncadd (%p648_p6), %s456_s27, 4294967168  ;;  %s465_s15 = scalar_lea.sflag [#allocation11], %s455_s26 }
  0xdc   : > { %853 = dma.done.wait (%p648_p6), %s465_s15, 128  }
  0xdd   : > { %855 = vsyncadd (%p648_p6), %s465_s15, 4294967168  ;;  %s29_s22 = sadd.s32 1, %s878_s22   ;;  %s1119_s0 = smov %s862_s18 }
  0xde   : > { %p26_p7 = scmp.ge.s32.totalorder %s29_s22, 4   ;;  %s1120_s18 = smov %s866_s19 }
  0xdf   : > { %s1121_s19 = smov %s972_s6  ;;  %s1122_s20 = smov %s874_s21 }
  0xe0   : > { %s1123_s21 = smov %s1125_s25  ;;  %28 = sbr.rel (!%p26_p7) target bundleno = 10 (0xa), region = 110 }
  0xe5   :  { %470 = vsyncpa [#allocation5], 1 }
  0xe6   :  { %472 = vsyncpa [#allocation5 + $0x1], 1 }
  0xe7   :  { %473 = vsyncpa [#allocation8], 1 }
  0xe8   :  { %475 = vsyncpa [#allocation8 + $0x1], 1 }
  0xe9   :  { %476 = vsyncpa [#allocation6], 1 }
  0xea   :  { %478 = vsyncpa [#allocation6 + $0x1], 1 }
  0xeb   :  { %479 = vsyncpa [#allocation11], 1 }
  0xec   :  { %481 = vsyncpa [#allocation11 + $0x1], 1 }

</bundles_post_ra>
